<compile_context>
chip_gen: v7x
topology: tpu7x:2x2x1
jax: 0.10.0
libtpu: 0.0.40
codegen_flags: <defaults>
</compile_context>

<pallas_src>
import functools

import jax
import jax.numpy as jnp
from jax import lax
from jax.experimental import pallas as pl
from jax.experimental.pallas import tpu as pltpu

N_RELATION_HEADS = 4


# ---------------------------------------------------------------------------
# Kernel 1: masked mean pooling over the sequence axis.
# ---------------------------------------------------------------------------
def _pool_kernel(m_ref, s_ref, t_ref, s_out, t_out):
    si = pl.program_id(1)                 # S (reduction) axis, innermost
    ns = pl.num_programs(1)

    @pl.when(si == 0)
    def _():
        s_out[...] = jnp.zeros_like(s_out)
        t_out[...] = jnp.zeros_like(t_out)

    # Whole mask is VMEM-resident as (n_s, B, tS); grab this step's slab by
    # indexing the untiled leading axis with a dynamic scalar.
    m = m_ref[si].astype(s_ref.dtype)[:, :, None]           # [B, tS, 1]
    # Multiply in the native dtype (exact for 0/1 masks); accumulate in f32.
    s_out[...] += jnp.sum((s_ref[...] * m).astype(jnp.float32), axis=1)
    t_out[...] += jnp.sum((t_ref[...] * m).astype(jnp.float32), axis=1)

    @pl.when(si == ns - 1)
    def _():
        m_all = m_ref[...].astype(jnp.float32)               # [n_s, B, tS]
        denom = jnp.sum(jnp.sum(m_all, axis=-1, keepdims=True), axis=0)  # [B, 1]
        inv = 1.0 / denom   # exact; rows with all-zero mask give NaN (matches torch)
        s_out[...] = s_out[...] * inv
        t_out[...] = t_out[...] * inv


# ---------------------------------------------------------------------------
# Kernel 2: per-head pairwise angle matrices + smooth-L1 'elementwise_mean'.
# ---------------------------------------------------------------------------
def _angle_loss_kernel(sa_ref, sf_ref, ta_ref, tf_ref, out_ref, *, inv_denom):
    h = pl.program_id(0)                  # relation head
    i = pl.program_id(1)                  # anchor block

    @pl.when(jnp.logical_and(h == 0, i == 0))
    def _():
        out_ref[...] = jnp.zeros_like(out_ref)

    def angle(anchor, full):                                  # [tI, d], [B, d]
        # diff[a, j] = full[j] - anchor[a]
        diff = full[None, :, :] - anchor[:, None, :]          # [tI, B, d]
        sumsq = jnp.sum(diff * diff, axis=-1, keepdims=True)
        # F.normalize(p=2, eps=1e-12): diff / max(||diff||, 1e-12)
        inv = lax.rsqrt(jnp.maximum(sumsq, 1e-24))
        unit = diff * inv                                     # zero rows stay 0
        # per-anchor gram: angle[a, j, k] = <unit[a, j], unit[a, k]>
        return jnp.einsum('ajd,akd->ajk', unit, unit,
                          preferred_element_type=jnp.float32)

    z = angle(sa_ref[0], sf_ref[0]) - angle(ta_ref[0], tf_ref[0])
    az = jnp.abs(z)
    l1 = jnp.where(az < 1.0, 0.5 * z * z, az - 0.5)           # smooth_l1, beta = 1
    out_ref[...] += jnp.sum(l1)

    @pl.when(jnp.logical_and(h == pl.num_programs(0) - 1,
                             i == pl.num_programs(1) - 1))
    def _():
        # 'elementwise_mean' == mean over all H * B^3 elements
        out_ref[...] = out_ref[...] * inv_denom


# ---------------------------------------------------------------------------
# Wrapper / tiling logic.
# ---------------------------------------------------------------------------
def _pick_tile(n, align, max_tile):
    """Largest multiple of `align` dividing `n` and <= max_tile; `n` itself if
    n <= max_tile; None if no aligned divisor exists."""
    if n <= max_tile:
        return n
    t = (max_tile // align) * align
    while t >= align:
        if n % t == 0:
            return t
        t -= align
    return None


def _vmem_capacity_bytes():
    try:
        cap = getattr(pltpu.get_tpu_info(), "vmem_capacity_bytes", None)
        if cap:
            return int(cap)
    except Exception:
        pass
    return 64 << 20   # conservative default (v7x per-TC VMEM)


def sample_loss(s_rep, t_rep, attention_mask, n_relation_heads=N_RELATION_HEADS):
    B, S, D = s_rep.shape
    assert D % n_relation_heads == 0
    H = n_relation_heads
    d = D // H

    elt = jnp.dtype(s_rep.dtype).itemsize
    vmem_cap = _vmem_capacity_bytes()
    big_vmem = vmem_cap >= (100 << 20)                # v5e / v6e (128 MiB VMEM)
    blk_cap = (12 << 20) if big_vmem else (6 << 20)   # per-input block budget
    vmem_ceiling = max(vmem_cap - (8 << 20), 32 << 20)

    # ---- D tile: lane-dense, and split so the "parallel" axis has >= 2 tiles
    # whenever D allows (keeps both v7x TensorCores busy on the mem-bound stage).
    if D >= 256:
        tD = _pick_tile(D, 128, min(512, D // 2)) or D
    else:
        tD = D

    # ---- S tile: prefer 128 alignment, then the dtype sublane pack, capped by
    # the per-input block budget (amortizes per-step grid overhead).
    sub_pack = max(8, 32 // elt)                      # 8 f32 / 16 bf16 / 32 int8
    ts_cap = max(sub_pack, min(4096, blk_cap // max(1, B * tD * elt)))
    tS = _pick_tile(S, 128, ts_cap) or _pick_tile(S, sub_pack, ts_cap) or S

    n_d, n_s = D // tD, S // tS

    # Mask reshaped to (n_s, B, tS): constant index_map -> DMA'd once, stays
    # VMEM-resident; per-step slab is picked on the untiled leading axis.
    mask3 = jnp.transpose(attention_mask.reshape(B, n_s, tS), (1, 0, 2))

    in_block = B * tS * tD * elt
    mask_bytes = B * S * jnp.dtype(attention_mask.dtype).itemsize
    out_block = B * tD * 4
    est1 = 4 * in_block + 2 * mask_bytes + 4 * out_block + (4 << 20)
    vmem1 = int(min(max(est1, 32 << 20), vmem_ceiling))

    s_pool, t_pool = pl.pallas_call(
        _pool_kernel,
        out_shape=(jax.ShapeDtypeStruct((B, D), jnp.float32),
                   jax.ShapeDtypeStruct((B, D), jnp.float32)),
        grid_spec=pltpu.PrefetchScalarGridSpec(
            num_scalar_prefetch=0,
            grid=(n_d, n_s),
            in_specs=[
                pl.BlockSpec((n_s, B, tS), lambda dd, ss: (0, 0, 0)),
                pl.BlockSpec((B, tS, tD), lambda dd, ss: (0, ss, dd)),
                pl.BlockSpec((B, tS, tD), lambda dd, ss: (0, ss, dd)),
            ],
            out_specs=[
                pl.BlockSpec((B, tD), lambda dd, ss: (0, dd)),
                pl.BlockSpec((B, tD), lambda dd, ss: (0, dd)),
            ],
        ),
        compiler_params=pltpu.CompilerParams(
            dimension_semantics=("parallel", "arbitrary"),
            vmem_limit_bytes=vmem1,
        ),
    )(mask3, s_rep, t_rep)

    # ---- Kernel 2: heads as a leading full-block axis (tiny wrapper reshape of
    # the pooled [B, D] tensors), grid over (head, anchor-block).
    s3 = jnp.transpose(s_pool.reshape(B, H, d), (1, 0, 2))    # [H, B, d]
    t3 = jnp.transpose(t_pool.reshape(B, H, d), (1, 0, 2))

    per_anchor = 4 * (4 * B * d + 3 * B * B)          # rough live f32 bytes / anchor
    ti_cap = max(8, min(B, (12 << 20) // max(1, per_anchor)))
    tI = _pick_tile(B, 8, ti_cap) or B                # multiple of 8, or full B
    n_i = B // tI

    est2 = tI * per_anchor + 4 * 4 * (tI + B) * d + (8 << 20)
    vmem2 = int(min(max(est2, 32 << 20), vmem_ceiling))

    total = pl.pallas_call(
        functools.partial(_angle_loss_kernel,
                          inv_denom=1.0 / float(H * B * B * B)),
        out_shape=jax.ShapeDtypeStruct((1, 1), jnp.float32),
        grid_spec=pltpu.PrefetchScalarGridSpec(
            num_scalar_prefetch=0,
            grid=(H, n_i),
            in_specs=[
                pl.BlockSpec((1, tI, d), lambda hh, ii: (hh, ii, 0)),   # s anchors
                pl.BlockSpec((1, B, d), lambda hh, ii: (hh, 0, 0)),     # s full
                pl.BlockSpec((1, tI, d), lambda hh, ii: (hh, ii, 0)),   # t anchors
                pl.BlockSpec((1, B, d), lambda hh, ii: (hh, 0, 0)),     # t full
            ],
            out_specs=pl.BlockSpec((1, 1), lambda hh, ii: (0, 0)),
        ),
        compiler_params=pltpu.CompilerParams(
            dimension_semantics=("arbitrary", "arbitrary"),
            vmem_limit_bytes=vmem2,
        ),
    )(s3, s3, t3, t3)

    return total[0, 0]


# ---------------------------------------------------------------------------
# Pure-JAX reference mirroring the PyTorch module (for the self-test).
# ---------------------------------------------------------------------------
def _ref_loss(s_rep, t_rep, mask, H):
    s_rep = s_rep.astype(jnp.float32)
    t_rep = t_rep.astype(jnp.float32)
    mask = mask.astype(jnp.float32)

    def pool(x):
        x = x * mask[:, :, None]
        return jnp.sum(x, axis=1) / jnp.sum(mask, axis=1, keepdims=True)

    def angle(x):
        B, D = x.shape
        xh = x.reshape(B, H, D // H).transpose(1, 0, 2)        # [H, B, d]
        diff = xh[:, None, :, :] - xh[:, :, None, :]           # [H, B, B, d]
        nrm = jnp.sqrt(jnp.sum(diff * diff, axis=-1, keepdims=True))
        unit = diff / jnp.maximum(nrm, 1e-12)
        return jnp.einsum('hijd,hikd->hijk', unit, unit)

    sa = angle(pool(s_rep))
    ta = angle(pool(t_rep))
    z = sa - ta
    az = jnp.abs(z)
    return jnp.mean(jnp.where(az < 1.0, 0.5 * z * z, az - 0.5))


if __name__ == "__main__":
    B, S, D = 8, 8, 32          # batch, seq, hidden ; n_relation_heads = 4 -> d = 8
    key = jax.random.PRNGKey(0)
    k1, k2, k3 = jax.random.split(key, 3)

    s_rep = jax.random.normal(k1, (B, S, D), dtype=jnp.float32)
    t_rep = jax.random.normal(k2, (B, S, D), dtype=jnp.float32)
    mask = (jax.random.uniform(k3, (B, S)) > 0.3).astype(jnp.float32)
    mask = mask.at[:, 0].set(1.0)   # guarantee at least one valid token per row

    loss = sample_loss(s_rep, t_rep, mask, N_RELATION_HEADS)
    loss = jax.block_until_ready(loss)

    ref = _ref_loss(s_rep, t_rep, mask, N_RELATION_HEADS)
    assert jnp.allclose(loss, ref, rtol=1e-5, atol=1e-5), (loss, ref)

    print("KERNEL_OK")
</pallas_src>

<mosaic_0001>
module attributes {stable_mosaic.version = 11 : i64} {
  func.func @_pool_kernel(%arg0: i32, %arg1: i32, %arg2: memref<1x8x8xf32, #tpu.memory_space<vmem>>, %arg3: memref<8x8x32xf32, #tpu.memory_space<vmem>>, %arg4: memref<8x8x32xf32, #tpu.memory_space<vmem>>, %arg5: memref<8x32xf32, #tpu.memory_space<vmem>>, %arg6: memref<8x32xf32, #tpu.memory_space<vmem>>) attributes {dimension_semantics = [#tpu.dimension_semantics<parallel>, #tpu.dimension_semantics<arbitrary>], iteration_bounds = array<i64: 1, 1>, scalar_prefetch = 0 : i64, scratch_operands = 0 : i64, tpu.core_type = #tpu.core_type<tc>, window_params = [{pipeline_mode = #tpu.pipeline_mode<synchronous>, transform_indices = @transform_0, window_bounds = array<i64: 1, 8, 8>}, {transform_indices = @transform_1, window_bounds = array<i64: 8, 8, 32>}, {transform_indices = @transform_2, window_bounds = array<i64: 8, 8, 32>}, {transform_indices = @transform_3, window_bounds = array<i64: 8, 32>}, {transform_indices = @transform_4, window_bounds = array<i64: 8, 32>}]} {
    %c0_i32 = arith.constant 0 : i32
    %0 = arith.cmpi eq, %arg1, %c0_i32 : i32
    %1 = arith.extui %0 : i1 to i32
    %c0_i32_0 = arith.constant 0 : i32
    %2 = arith.cmpi ne, %1, %c0_i32_0 : i32
    scf.if %2 {
      %cst_19 = arith.constant 0.000000e+00 : f32
      %24 = vector.broadcast %cst_19 : f32 to vector<8x32xf32>
      %c0_20 = arith.constant 0 : index
      %c0_21 = arith.constant 0 : index
      %25 = vector.load %arg5[%c0_20, %c0_21] : memref<8x32xf32, #tpu.memory_space<vmem>>, vector<8x32xf32>
      tpu.vector_store %arg5[%c0_20, %c0_21], %24 {strides = array<i32>} : memref<8x32xf32, #tpu.memory_space<vmem>>, vector<8x32xf32>,
      %cst_22 = arith.constant 0.000000e+00 : f32
      %26 = vector.broadcast %cst_22 : f32 to vector<8x32xf32>
      %c0_23 = arith.constant 0 : index
      %c0_24 = arith.constant 0 : index
      %27 = vector.load %arg6[%c0_23, %c0_24] : memref<8x32xf32, #tpu.memory_space<vmem>>, vector<8x32xf32>
      tpu.vector_store %arg6[%c0_23, %c0_24], %26 {strides = array<i32>} : memref<8x32xf32, #tpu.memory_space<vmem>>, vector<8x32xf32>,
    } else {
    }
    %3 = arith.index_cast %arg1 : i32 to index
    %c0 = arith.constant 0 : index
    %c0_1 = arith.constant 0 : index
    %4 = vector.load %arg2[%3, %c0, %c0_1] : memref<1x8x8xf32, #tpu.memory_space<vmem>>, vector<1x8x8xf32>
    %5 = vector.shape_cast %4 : vector<1x8x8xf32> to vector<8x8xf32>
    %6 = vector.shape_cast %5 : vector<8x8xf32> to vector<8x8x1xf32>
    %c0_2 = arith.constant 0 : index
    %c0_3 = arith.constant 0 : index
    %7 = vector.load %arg5[%c0_2, %c0_3] : memref<8x32xf32, #tpu.memory_space<vmem>>, vector<8x32xf32>
    %c0_4 = arith.constant 0 : index
    %c0_5 = arith.constant 0 : index
    %c0_6 = arith.constant 0 : index
    %8 = vector.load %arg3[%c0_4, %c0_5, %c0_6] : memref<8x8x32xf32, #tpu.memory_space<vmem>>, vector<8x8x32xf32>
    %9 = vector.broadcast %6 : vector<8x8x1xf32> to vector<8x8x32xf32>
    %10 = arith.mulf %8, %9 : vector<8x8x32xf32>
    %cst = arith.constant dense<0.000000e+00> : vector<8x32xf32>
    %11 = vector.multi_reduction <add>, %10, %cst [1] : vector<8x8x32xf32> to vector<8x32xf32>
    %12 = arith.addf %7, %11 : vector<8x32xf32>
    %c0_7 = arith.constant 0 : index
    %c0_8 = arith.constant 0 : index
    %13 = vector.load %arg5[%c0_7, %c0_8] : memref<8x32xf32, #tpu.memory_space<vmem>>, vector<8x32xf32>
    tpu.vector_store %arg5[%c0_7, %c0_8], %12 {strides = array<i32>} : memref<8x32xf32, #tpu.memory_space<vmem>>, vector<8x32xf32>,
    %c0_9 = arith.constant 0 : index
    %c0_10 = arith.constant 0 : index
    %14 = vector.load %arg6[%c0_9, %c0_10] : memref<8x32xf32, #tpu.memory_space<vmem>>, vector<8x32xf32>
    %c0_11 = arith.constant 0 : index
    %c0_12 = arith.constant 0 : index
    %c0_13 = arith.constant 0 : index
    %15 = vector.load %arg4[%c0_11, %c0_12, %c0_13] : memref<8x8x32xf32, #tpu.memory_space<vmem>>, vector<8x8x32xf32>
    %16 = vector.broadcast %6 : vector<8x8x1xf32> to vector<8x8x32xf32>
    %17 = arith.mulf %15, %16 : vector<8x8x32xf32>
    %cst_14 = arith.constant dense<0.000000e+00> : vector<8x32xf32>
    %18 = vector.multi_reduction <add>, %17, %cst_14 [1] : vector<8x8x32xf32> to vector<8x32xf32>
    %19 = arith.addf %14, %18 : vector<8x32xf32>
    %c0_15 = arith.constant 0 : index
    %c0_16 = arith.constant 0 : index
    %20 = vector.load %arg6[%c0_15, %c0_16] : memref<8x32xf32, #tpu.memory_space<vmem>>, vector<8x32xf32>
    tpu.vector_store %arg6[%c0_15, %c0_16], %19 {strides = array<i32>} : memref<8x32xf32, #tpu.memory_space<vmem>>, vector<8x32xf32>,
    %c0_i32_17 = arith.constant 0 : i32
    %21 = arith.cmpi eq, %arg1, %c0_i32_17 : i32
    %22 = arith.extui %21 : i1 to i32
    %c0_i32_18 = arith.constant 0 : i32
    %23 = arith.cmpi ne, %22, %c0_i32_18 : i32
    scf.if %23 {
      %c0_19 = arith.constant 0 : index
      %c0_20 = arith.constant 0 : index
      %c0_21 = arith.constant 0 : index
      %24 = vector.load %arg2[%c0_19, %c0_20, %c0_21] : memref<1x8x8xf32, #tpu.memory_space<vmem>>, vector<1x8x8xf32>
      %cst_22 = arith.constant dense<0.000000e+00> : vector<1x8xf32>
      %25 = vector.multi_reduction <add>, %24, %cst_22 [2] : vector<1x8x8xf32> to vector<1x8xf32>
      %26 = vector.shape_cast %25 : vector<1x8xf32> to vector<1x8x1xf32>
      %cst_23 = arith.constant dense<0.000000e+00> : vector<8x1xf32>
      %27 = vector.multi_reduction <add>, %26, %cst_23 [0] : vector<1x8x1xf32> to vector<8x1xf32>
      %cst_24 = arith.constant 1.000000e+00 : f32
      %28 = vector.broadcast %cst_24 : f32 to vector<8x1xf32>
      %29 = arith.divf %28, %27 : vector<8x1xf32>
      %c0_25 = arith.constant 0 : index
      %c0_26 = arith.constant 0 : index
      %30 = vector.load %arg5[%c0_25, %c0_26] : memref<8x32xf32, #tpu.memory_space<vmem>>, vector<8x32xf32>
      %31 = vector.broadcast %29 : vector<8x1xf32> to vector<8x32xf32>
      %32 = arith.mulf %30, %31 : vector<8x32xf32>
      %c0_27 = arith.constant 0 : index
      %c0_28 = arith.constant 0 : index
      %33 = vector.load %arg5[%c0_27, %c0_28] : memref<8x32xf32, #tpu.memory_space<vmem>>, vector<8x32xf32>
      tpu.vector_store %arg5[%c0_27, %c0_28], %32 {strides = array<i32>} : memref<8x32xf32, #tpu.memory_space<vmem>>, vector<8x32xf32>,
      %c0_29 = arith.constant 0 : index
      %c0_30 = arith.constant 0 : index
      %34 = vector.load %arg6[%c0_29, %c0_30] : memref<8x32xf32, #tpu.memory_space<vmem>>, vector<8x32xf32>
      %35 = vector.broadcast %29 : vector<8x1xf32> to vector<8x32xf32>
      %36 = arith.mulf %34, %35 : vector<8x32xf32>
      %c0_31 = arith.constant 0 : index
      %c0_32 = arith.constant 0 : index
      %37 = vector.load %arg6[%c0_31, %c0_32] : memref<8x32xf32, #tpu.memory_space<vmem>>, vector<8x32xf32>
      tpu.vector_store %arg6[%c0_31, %c0_32], %36 {strides = array<i32>} : memref<8x32xf32, #tpu.memory_space<vmem>>, vector<8x32xf32>,
    } else {
    }
    return
  }
  func.func @transform_0(%arg0: i32, %arg1: i32) -> (i32, i32, i32) {
    %c0_i32 = arith.constant 0 : i32
    %c0_i32_0 = arith.constant 0 : i32
    %c0_i32_1 = arith.constant 0 : i32
    %c0_i32_2 = arith.constant 0 : i32
    return %c0_i32, %c0_i32_0, %c0_i32_1 : i32, i32, i32
  }
  func.func @transform_1(%arg0: i32, %arg1: i32) -> (i32, i32, i32) {
    %c0_i32 = arith.constant 0 : i32
    %c0_i32_0 = arith.constant 0 : i32
    return %c0_i32, %arg1, %arg0 : i32, i32, i32
  }
  func.func @transform_2(%arg0: i32, %arg1: i32) -> (i32, i32, i32) {
    %c0_i32 = arith.constant 0 : i32
    %c0_i32_0 = arith.constant 0 : i32
    return %c0_i32, %arg1, %arg0 : i32, i32, i32
  }
  func.func @transform_3(%arg0: i32, %arg1: i32) -> (i32, i32) {
    %c0_i32 = arith.constant 0 : i32
    %c0_i32_0 = arith.constant 0 : i32
    return %c0_i32, %arg0 : i32, i32
  }
  func.func @transform_4(%arg0: i32, %arg1: i32) -> (i32, i32) {
    %c0_i32 = arith.constant 0 : i32
    %c0_i32_0 = arith.constant 0 : i32
    return %c0_i32, %arg0 : i32, i32
  }
}

</mosaic_0001>

<bundles_post_ra>
// kernel: tpu_custom_call.1
= control target key start
LH: loop header
LB: loop body
LE: loop exit
PB: predicated region body
PF: predicated region fallthrough
CT: control target
= control target key end

     0   :  { %10 = vsyncpa [#allocation3], 0  ;;  %s617_s0 = inlined_call_operand.hbm [shape: f32[1,8,8], index: 0, kind: input, shape index: {}]   ;;  %s618_s1 = inlined_call_operand.hbm [shape: f32[8,8,32], index: 1, kind: input, shape index: {}]   ;;  %s619_s2 = inlined_call_operand.hbm [shape: f32[8,8,32], index: 2, kind: input, shape index: {}]   ;;  %s620_s3 = inlined_call_operand.hbm [shape: f32[8,32], index: 3, kind: output, shape index: {0}]   ;;  %s621_s4 = inlined_call_operand.hbm [shape: f32[8,32], index: 4, kind: output, shape index: {1}]  }
   0x1   :  { %11 = vsyncpa [#allocation6], 0 }
   0x2   :  { %12 = vsyncpa [#allocation4], 0 }
   0x3   :  { %13 = vsyncpa [#allocation10], 0  ;;  %s488_s15 = smov [#allocation5]   ;;  %s370_s19 = scalar_lea.hbm %s618_s1, 1024 }
   0x4   :  { %s29_s16 = sshll.u32 %s488_s15, 4  ;;  %p371_p0 = scmp.ne.s32.totalorder %s618_s1, %s370_s19  ;;  %s30_s16 = int_to_ptr.vmem [resolvable:$true] %s29_s16 }
   0x5   :  { %p374_p1 = scmp.lt.u32.totalorder %s370_s19, %s618_s1 }
   0x7   :  { %p376_p2 = pnand %p374_p1, %p371_p0 }
   0x9   :  { %379 = shalt.err (!%p376_p2)
}
   0xa   :  { %s380_s24 = scalar_lea.vmem %s30_s16, 1024  ;;  %p385_p4 = scmp.lt.s32.totalorder %s30_s16, %s30_s16 }
   0xb   :  { %p381_p3 = scmp.ne.s32.totalorder %s30_s16, %s380_s24  ;;  %p386_p5 = scmp.lt.s32.totalorder %s380_s24, %s380_s24 }
   0xd   :  { %p387_p6 = por %p386_p5, %p385_p4 }
   0xf   :  { %p388_p7 = pnand %p387_p6, %p381_p3 }
  0x11   :  { %391 = shalt.err (!%p388_p7)
}
  0x12   :  { %s489_s25 = smov 128   ;;  %s490_s26 = smov 8  }
  0x13   :  { %35 = dma.hbm_to_vmem [thread:$0]  %s618_s1, 1024, %s30_s16, [#allocation6], %s489_s25, %s489_s25, %s490_s26  }
  0x14   :  { %s491_s29 = smov [#allocation2]   ;;  %s492_s5 = smov [#allocation7]  }
  0x15   :  { %s20_s30 = sshll.u32 %s491_s29, 4  ;;  %s41_s6 = sshll.u32 %s492_s5, 4  ;;  %s21_s30 = int_to_ptr.vmem [resolvable:$true] %s20_s30  ;;  %s42_s6 = int_to_ptr.vmem [resolvable:$true] %s41_s6 }
  0x16   :  { %s392_s9 = scalar_lea.hbm %s617_s0, 128 }
  0x17   :  { %p393_p8 = scmp.ne.s32.totalorder %s617_s0, %s392_s9  ;;  %p396_p9 = scmp.lt.u32.totalorder %s392_s9, %s617_s0 }
  0x19   :  { %p398_p10 = pnand %p396_p9, %p393_p8 }
  0x1b   :  { %401 = shalt.err (!%p398_p10)
}
  0x1c   :  { %s402_s1 = scalar_lea.vmem %s21_s30, 128  ;;  %p407_p12 = scmp.lt.s32.totalorder %s21_s30, %s21_s30 }
  0x1d   :  { %p403_p11 = scmp.ne.s32.totalorder %s21_s30, %s402_s1  ;;  %p408_p13 = scmp.lt.s32.totalorder %s402_s1, %s402_s1 }
  0x1f   :  { %p409_p0 = por %p408_p13, %p407_p12 }
  0x21   :  { %p410_p1 = pnand %p409_p0, %p403_p11 }
  0x23   :  { %413 = shalt.err (!%p410_p1)
}
  0x24   :  { %23 = dma.hbm_to_vmem [thread:$0]  %s617_s0, 128, %s21_s30, [#allocation3]  }
  0x25   :  { %s414_s18 = scalar_lea.hbm %s619_s2, 1024 }
  0x26   :  { %p415_p2 = scmp.ne.s32.totalorder %s619_s2, %s414_s18  ;;  %p418_p3 = scmp.lt.u32.totalorder %s414_s18, %s619_s2 }
  0x28   :  { %p420_p4 = pnand %p418_p3, %p415_p2 }
  0x2a   :  { %423 = shalt.err (!%p420_p4)
}
  0x2b   :  { %s424_s23 = scalar_lea.vmem %s42_s6, 1024  ;;  %p429_p6 = scmp.lt.s32.totalorder %s42_s6, %s42_s6 }
  0x2c   :  { %p425_p5 = scmp.ne.s32.totalorder %s42_s6, %s424_s23  ;;  %p430_p7 = scmp.lt.s32.totalorder %s424_s23, %s424_s23 }
  0x2e   :  { %p431_p8 = por %p430_p7, %p429_p6 }
  0x30   :  { %p432_p9 = pnand %p431_p8, %p425_p5 }
  0x32   :  { %435 = shalt.err (!%p432_p9)
}
  0x33   :  { %47 = dma.hbm_to_vmem [thread:$0]  %s619_s2, 1024, %s42_s6, [#allocation6], %s489_s25, %s489_s25, %s490_s26  }
  0x34   :  { %480 = dma.done.wait [#allocation3], 128  }
  0x35   :  { %481 = vsyncadd [#allocation3], 4294967168 }
  0x36   :  { %482 = dma.done.wait [#allocation6], 2048  }
  0x37   :  { %483 = vsyncadd [#allocation6], 4294965248  ;;  %v67_v0 = vlaneseq  ;;  %v66_v6 = vld [vmem:[#allocation2] sm:$0xff]  ;;  %vm61_vm0 = vcmask 261120   ;;  %v493_v19 = vmov 0.0   ;;  %vm317_vm1 = vcmask 64512  }
  0x38   :  { %62 = vst.msk [vmem:[#allocation8] sm:$0xff] %vm61_vm0, %v493_v19  ;;  %63 = vst.msk [vmem:[#allocation9] sm:$0xff] %vm61_vm0, %v493_v19  ;;  %v318_v20 = vsel %vm317_vm1, %v66_v6, 0.0  ;;  %v124_v21 = vld [vmem:[#allocation5] sm:$0xff]  ;;  %v126_v23 = vld [vmem:[#allocation5 + $0x10] sm:$0xff]  ;;  %vm205_vm2 = vcmask 1041409  }
  0x39   :  { %v68_v1 = vshrl.u32 %v67_v0, 7  ;;  %v223_v22 = vld [vmem:[#allocation7] sm:$0xff]  ;;  %v225_v24 = vld [vmem:[#allocation7 + $0x10] sm:$0xff]  ;;  %v125_v31 = vld [vmem:[#allocation5 + $0x8] sm:$0xff]  ;;  %vm207_vm3 = vcmask 1042434   ;;  %vm209_vm4 = vcmask 1043459  }
  0x3a   :  { %v224_v32 = vld [vmem:[#allocation7 + $0x8] sm:$0xff]  ;;  %v127_v33 = vld [vmem:[#allocation5 + $0x18] sm:$0xff]  ;;  %vm211_vm5 = vcmask 1044484   ;;  %vm213_vm6 = vcmask 1045509   ;;  %vm215_vm7 = vcmask 1046534   ;;  %vm217_vm8 = vcmask 1047559  }
  0x3b   :  { %v69_v2 = vsub.s32 0, %v68_v1  ;;  %v83_v3 = vsub.s32 2, %v68_v1  ;;  %v76_v4 = vsub.s32 1, %v68_v1  ;;  %v90_v5 = vsub.s32 3, %v68_v1  ;;  %v226_v34 = vld [vmem:[#allocation7 + $0x18] sm:$0xff]  ;;  %s494_s2 = smov [#allocation8]  }
  0x3c   :  { %v97_v11 = vsub.s32 4, %v68_v1  ;;  %v104_v12 = vsub.s32 5, %v68_v1  ;;  %v111_v15 = vsub.s32 6, %v68_v1  ;;  %v118_v16 = vsub.s32 7, %v68_v1  ;;  %s336_s25 = sshll.u32 %s494_s2, 4  ;;  %s495_s26 = smov [#allocation9]   ;;  %s337_s25 = int_to_ptr.vmem [resolvable:$true] %s336_s25 }
  0x3d   :  { %v70_v7 = vrot.slane %v66_v6, %v69_v2  ;;  %v84_v8 = vrot.slane %v66_v6, %v83_v3  ;;  %v77_v9 = vrot.slane %v66_v6, %v76_v4  ;;  %v91_v10 = vrot.slane %v66_v6, %v90_v5  ;;  %s346_s27 = sshll.u32 %s495_s26, 4  ;;  %s436_s28 = scalar_lea.vmem %s337_s25, 128  ;;  %s347_s27 = int_to_ptr.vmem [resolvable:$true] %s346_s27 }
  0x3e   :  { %v98_v13 = vrot.slane %v66_v6, %v97_v11  ;;  %v105_v14 = vrot.slane %v66_v6, %v104_v12  ;;  %v112_v17 = vrot.slane %v66_v6, %v111_v15  ;;  %v119_v18 = vrot.slane %v66_v6, %v118_v16  ;;  %v129_v16 = vld [vmem:[#allocation5 + $0x28] sm:$0xff]  ;;  %p437_p10 = scmp.ne.s32.totalorder %s337_s25, %s436_s28  ;;  %p441_p11 = scmp.lt.s32.totalorder %s337_s25, %s337_s25 }
  0x3f   :  { %72 = vbcast.lane.b32.xlu0 %v70_v7, 256  ;;  %86 = vbcast.lane.b32.xlu1 %v84_v8, 256  ;;  %p442_p12 = scmp.lt.s32.totalorder %s436_s28, %s436_s28 }
  0x41   :  { %p443_p13 = por %p442_p12, %p441_p11 }
  0x43   :  { %79 = vbcast.lane.b32.xlu0 %v77_v9, 256  ;;  %93 = vbcast.lane.b32.xlu1 %v91_v10, 256  ;;  %v128_v9 = vld [vmem:[#allocation5 + $0x20] sm:$0xff]  ;;  %p444_p0 = pnand %p443_p13, %p437_p10 }
  0x44   :  { %v227_v10 = vld [vmem:[#allocation7 + $0x20] sm:$0xff] }
  0x47   :  { %100 = vbcast.lane.b32.xlu0 %v98_v13, 256  ;;  %107 = vbcast.lane.b32.xlu1 %v105_v14, 256 }
  0x4b   :  { %114 = vbcast.lane.b32.xlu0 %v112_v17, 256  ;;  %121 = vbcast.lane.b32.xlu1 %v119_v18, 256  ;;  %v228_v17 = vld [vmem:[#allocation7 + $0x28] sm:$0xff] }
  0x6a   :  { %319 = vadd.xlane.f32.xlu0 %v318_v20 }
  0xb1   :  { %v73_v25 = vpop.permute.xlu0 %72  ;;  %v87_v26 = vpop.permute.xlu1 %86 }
  0xb2   :  { %v132_v27 = vmul.f32 %v124_v21, %v73_v25  ;;  %v231_v28 = vmul.f32 %v223_v22, %v73_v25  ;;  %v134_v29 = vmul.f32 %v126_v23, %v87_v26  ;;  %v233_v30 = vmul.f32 %v225_v24, %v87_v26 }
  0xb4   :  { %v141_v35 = vsel %vm61_vm0, %v132_v27, 0.0  ;;  %v239_v36 = vsel %vm61_vm0, %v231_v28, 0.0  ;;  %v155_v37 = vsel %vm61_vm0, %v134_v29, 0.0  ;;  %v253_v38 = vsel %vm61_vm0, %v233_v30, 0.0 }
  0xb5   :  { %v142_v39 = vrot.slane %v141_v35, 4  ;;  %v240_v40 = vrot.slane %v239_v36, 4  ;;  %v156_v41 = vrot.slane %v155_v37, 4  ;;  %v254_v42 = vrot.slane %v253_v38, 4  ;;  %v80_v43 = vpop.permute.xlu0 %79  ;;  %v94_v44 = vpop.permute.xlu1 %93 }
  0xb6   :  { %v133_v45 = vmul.f32 %v125_v31, %v80_v43  ;;  %v232_v46 = vmul.f32 %v224_v32, %v80_v43  ;;  %v135_v47 = vmul.f32 %v127_v33, %v94_v44  ;;  %v234_v48 = vmul.f32 %v226_v34, %v94_v44 }
  0xb7   :  { %v143_v49 = vadd.f32 %v142_v39, %v141_v35  ;;  %v241_v50 = vadd.f32 %v240_v40, %v239_v36  ;;  %v157_v51 = vadd.f32 %v156_v41, %v155_v37  ;;  %v255_v52 = vadd.f32 %v254_v42, %v253_v38  ;;  %v130_v39 = vld [vmem:[#allocation5 + $0x30] sm:$0xff] }
  0xb8   :  { %v148_v53 = vsel %vm61_vm0, %v133_v45, 0.0  ;;  %v246_v54 = vsel %vm61_vm0, %v232_v46, 0.0  ;;  %v162_v55 = vsel %vm61_vm0, %v135_v47, 0.0  ;;  %v260_v56 = vsel %vm61_vm0, %v234_v48, 0.0  ;;  %v229_v40 = vld [vmem:[#allocation7 + $0x30] sm:$0xff] }
  0xb9   :  { %v144_v57 = vrot.slane %v143_v49, 2  ;;  %v242_v58 = vrot.slane %v241_v50, 2  ;;  %v158_v59 = vrot.slane %v157_v51, 2  ;;  %v256_v60 = vrot.slane %v255_v52, 2  ;;  %v101_v11 = vpop.permute.xlu0 %100  ;;  %v108_v18 = vpop.permute.xlu1 %107 }
  0xba   :  { %v149_v61 = vrot.slane %v148_v53, 4  ;;  %v247_v62 = vrot.slane %v246_v54, 4  ;;  %v163_v63 = vrot.slane %v162_v55, 4  ;;  %v261_v0 = vrot.slane %v260_v56, 4 }
  0xbb   :  { %v145_v1 = vadd.f32 %v144_v57, %v143_v49  ;;  %v243_v2 = vadd.f32 %v242_v58, %v241_v50  ;;  %v159_v3 = vadd.f32 %v158_v59, %v157_v51  ;;  %v257_v4 = vadd.f32 %v256_v60, %v255_v52 }
  0xbc   :  { %v150_v5 = vadd.f32 %v149_v61, %v148_v53  ;;  %v248_v6 = vadd.f32 %v247_v62, %v246_v54  ;;  %v164_v7 = vadd.f32 %v163_v63, %v162_v55  ;;  %v262_v8 = vadd.f32 %v261_v0, %v260_v56  ;;  %v131_v62 = vld [vmem:[#allocation5 + $0x38] sm:$0xff] }
  0xbd   :  { %v146_v19 = vrot.slane %v145_v1, 1  ;;  %v244_v20 = vrot.slane %v243_v2, 1  ;;  %v160_v21 = vrot.slane %v159_v3, 1  ;;  %v258_v22 = vrot.slane %v257_v4, 1  ;;  %v115_v41 = vpop.permute.xlu0 %114  ;;  %v230_v63 = vld [vmem:[#allocation7 + $0x38] sm:$0xff]  ;;  %v122_v0 = vpop.permute.xlu1 %121 }
  0xbe   :  { %v151_v12 = vrot.slane %v150_v5, 2  ;;  %v249_v13 = vrot.slane %v248_v6, 2  ;;  %v165_v14 = vrot.slane %v164_v7, 2  ;;  %v263_v15 = vrot.slane %v262_v8, 2 }
  0xbf   :  { %v136_v27 = vmul.f32 %v128_v9, %v101_v11  ;;  %v235_v28 = vmul.f32 %v227_v10, %v101_v11  ;;  %v137_v29 = vmul.f32 %v129_v16, %v108_v18  ;;  %v236_v30 = vmul.f32 %v228_v17, %v108_v18 }
  0xc0   :  { %v152_v23 = vadd.f32 %v151_v12, %v150_v5  ;;  %v250_v24 = vadd.f32 %v249_v13, %v248_v6  ;;  %v166_v25 = vadd.f32 %v165_v14, %v164_v7  ;;  %v264_v26 = vadd.f32 %v263_v15, %v262_v8 }
  0xc1   :  { %v169_v35 = vsel %vm61_vm0, %v136_v27, 0.0  ;;  %v267_v36 = vsel %vm61_vm0, %v235_v28, 0.0  ;;  %v176_v37 = vsel %vm61_vm0, %v137_v29, 0.0  ;;  %v274_v38 = vsel %vm61_vm0, %v236_v30, 0.0 }
  0xc2   :  { %v153_v31 = vrot.slane %v152_v23, 1  ;;  %v251_v32 = vrot.slane %v250_v24, 1  ;;  %v167_v33 = vrot.slane %v166_v25, 1  ;;  %v265_v34 = vrot.slane %v264_v26, 1 }
  0xc3   :  { %v147_v42 = vadd.f32 %v146_v19, %v145_v1  ;;  %v245_v43 = vadd.f32 %v244_v20, %v243_v2  ;;  %v170_v46 = vrot.slane %v169_v35, 4  ;;  %v268_v47 = vrot.slane %v267_v36, 4 }
  0xc4   :  { %v154_v44 = vadd.f32 %v153_v31, %v152_v23  ;;  %v252_v45 = vadd.f32 %v251_v32, %v250_v24  ;;  %v177_v48 = vrot.slane %v176_v37, 4  ;;  %v275_v49 = vrot.slane %v274_v38, 4 }
  0xc5   :  { %v161_v50 = vadd.f32 %v160_v21, %v159_v3  ;;  %v259_v51 = vadd.f32 %v258_v22, %v257_v4  ;;  %v138_v52 = vmul.f32 %v130_v39, %v115_v41  ;;  %v237_v53 = vmul.f32 %v229_v40, %v115_v41 }
  0xc6   :  { %v168_v54 = vadd.f32 %v167_v33, %v166_v25  ;;  %v266_v55 = vadd.f32 %v265_v34, %v264_v26  ;;  %v171_v56 = vadd.f32 %v170_v46, %v169_v35  ;;  %v269_v57 = vadd.f32 %v268_v47, %v267_v36 }
  0xc7   :  { %v206_v58 = vsel %vm205_vm2, %v154_v44, %v147_v42  ;;  %v303_v59 = vsel %vm205_vm2, %v252_v45, %v245_v43  ;;  %v178_v60 = vadd.f32 %v177_v48, %v176_v37  ;;  %v276_v61 = vadd.f32 %v275_v49, %v274_v38 }
  0xc8   :  { %v172_v1 = vrot.slane %v171_v56, 2  ;;  %v270_v2 = vrot.slane %v269_v57, 2  ;;  %v183_v3 = vsel %vm61_vm0, %v138_v52, 0.0  ;;  %v281_v4 = vsel %vm61_vm0, %v237_v53, 0.0 }
  0xc9   :  { %v179_v5 = vrot.slane %v178_v60, 2  ;;  %v277_v6 = vrot.slane %v276_v61, 2  ;;  %v184_v7 = vrot.slane %v183_v3, 4  ;;  %v282_v8 = vrot.slane %v281_v4, 4 }
  0xca   :  { %v173_v9 = vadd.f32 %v172_v1, %v171_v56  ;;  %v271_v10 = vadd.f32 %v270_v2, %v269_v57  ;;  %v139_v11 = vmul.f32 %v131_v62, %v122_v0  ;;  %v238_v12 = vmul.f32 %v230_v63, %v122_v0  ;;  %v222_v57 = vld [vmem:[#allocation9] sm:$0xff] }
  0xcb   :  { %v180_v13 = vadd.f32 %v179_v5, %v178_v60  ;;  %v278_v14 = vadd.f32 %v277_v6, %v276_v61  ;;  %v185_v15 = vadd.f32 %v184_v7, %v183_v3  ;;  %v283_v16 = vadd.f32 %v282_v8, %v281_v4 }
  0xcc   :  { %v174_v17 = vrot.slane %v173_v9, 1  ;;  %v272_v18 = vrot.slane %v271_v10, 1  ;;  %v190_v19 = vsel %vm61_vm0, %v139_v11, 0.0  ;;  %v288_v20 = vsel %vm61_vm0, %v238_v12, 0.0 }
  0xcd   :  { %v208_v21 = vsel %vm207_vm3, %v161_v50, %v206_v58  ;;  %v304_v22 = vsel %vm207_vm3, %v259_v51, %v303_v59  ;;  %v186_v23 = vrot.slane %v185_v15, 2  ;;  %v284_v24 = vrot.slane %v283_v16, 2 }
  0xce   :  { %v181_v25 = vrot.slane %v180_v13, 1  ;;  %v279_v26 = vrot.slane %v278_v14, 1  ;;  %v191_v27 = vrot.slane %v190_v19, 4  ;;  %v289_v28 = vrot.slane %v288_v20, 4 }
  0xcf   :  { %v175_v29 = vadd.f32 %v174_v17, %v173_v9  ;;  %v273_v30 = vadd.f32 %v272_v18, %v271_v10  ;;  %v187_v31 = vadd.f32 %v186_v23, %v185_v15  ;;  %v285_v32 = vadd.f32 %v284_v24, %v283_v16 }
  0xd0   :  { %v210_v33 = vsel %vm209_vm4, %v168_v54, %v208_v21  ;;  %v305_v34 = vsel %vm209_vm4, %v266_v55, %v304_v22  ;;  %v192_v35 = vadd.f32 %v191_v27, %v190_v19  ;;  %v290_v36 = vadd.f32 %v289_v28, %v288_v20  ;;  %v123_v55 = vld [vmem:[#allocation8] sm:$0xff] }
  0xd1   :  { %v188_v37 = vrot.slane %v187_v31, 1  ;;  %v286_v38 = vrot.slane %v285_v32, 1  ;;  %v182_v39 = vadd.f32 %v181_v25, %v180_v13  ;;  %v280_v40 = vadd.f32 %v279_v26, %v278_v14 }
  0xd2   :  { %v193_v41 = vrot.slane %v192_v35, 2  ;;  %v291_v42 = vrot.slane %v290_v36, 2  ;;  %v212_v43 = vsel %vm211_vm5, %v175_v29, %v210_v33  ;;  %v306_v44 = vsel %vm211_vm5, %v273_v30, %v305_v34 }
  0xd3   :  { %v189_v45 = vadd.f32 %v188_v37, %v187_v31  ;;  %v287_v46 = vadd.f32 %v286_v38, %v285_v32  ;;  %v214_v49 = vsel %vm213_vm6, %v182_v39, %v212_v43  ;;  %v307_v50 = vsel %vm213_vm6, %v280_v40, %v306_v44 }
  0xd4   :  { %v194_v47 = vadd.f32 %v193_v41, %v192_v35  ;;  %v292_v48 = vadd.f32 %v291_v42, %v290_v36 }
  0xd5   :  { %v216_v53 = vsel %vm215_vm7, %v189_v45, %v214_v49  ;;  %v308_v54 = vsel %vm215_vm7, %v287_v46, %v307_v50 }
  0xd6   :  { %v195_v51 = vrot.slane %v194_v47, 1  ;;  %v293_v52 = vrot.slane %v292_v48, 1 }
  0xd8   :  { %v196_v56 = vadd.f32 %v195_v51, %v194_v47  ;;  %v294_v58 = vadd.f32 %v293_v52, %v292_v48 }
  0xda   :  { %v218_v59 = vsel %vm217_vm8, %v196_v56, %v216_v53  ;;  %v309_v60 = vsel %vm217_vm8, %v294_v58, %v308_v54 }
  0xdb   :  { %v220_v61 = vadd.f32 %v218_v59, %v123_v55  ;;  %v311_v62 = vadd.f32 %v309_v60, %v222_v57 }
  0xdd   :  { %221 = vst.msk [vmem:[#allocation8] sm:$0xff] %vm61_vm0, %v220_v61  ;;  %312 = vst.msk [vmem:[#allocation9] sm:$0xff] %vm61_vm0, %v311_v62 }
  0xe4   :  { %v324_v1 = vld [vmem:[#allocation8] sm:$0xff]  ;;  %v327_v2 = vld [vmem:[#allocation9] sm:$0xff] }
  0xf7   :  { %v320_v63 = vpop.xlane.xlu0 %319 }
  0xf8   :  { %368 = vrcp.f32 %v320_v63 }
 0x102   :  { %v369_v0 = vpop.eup %368 }
 0x103   :  { %v325_v3 = vmul.f32 %v369_v0, %v324_v1  ;;  %v328_v4 = vmul.f32 %v369_v0, %v327_v2 }
 0x105   :  { %326 = vst.msk [vmem:[#allocation8] sm:$0xff] %vm61_vm0, %v325_v3  ;;  %329 = vst.msk [vmem:[#allocation9] sm:$0xff] %vm61_vm0, %v328_v4 }
 0x106   :  { %447 = shalt.err (!%p444_p0)
}
 0x107   :  { %s448_s5 = scalar_lea.hbm %s620_s3, 128 }
 0x108   :  { %p449_p1 = scmp.ne.s32.totalorder %s620_s3, %s448_s5  ;;  %p452_p2 = scmp.lt.u32.totalorder %s448_s5, %s620_s3 }
 0x10a   :  { %p454_p3 = pnand %p452_p2, %p449_p1 }
 0x10c   :  { %457 = shalt.err (!%p454_p3)
}
 0x10d   :  { %339 = dma.vmem_to_hbm [thread:$0]  %s337_s25, 128, %s620_s3, [#allocation4]  }
 0x10e   :  { %s458_s12 = scalar_lea.vmem %s347_s27, 128  ;;  %p463_p5 = scmp.lt.s32.totalorder %s347_s27, %s347_s27 }
 0x10f   :  { %p459_p4 = scmp.ne.s32.totalorder %s347_s27, %s458_s12  ;;  %p464_p6 = scmp.lt.s32.totalorder %s458_s12, %s458_s12 }
 0x111   :  { %p465_p7 = por %p464_p6, %p463_p5 }
 0x113   :  { %p466_p8 = pnand %p465_p7, %p459_p4 }
 0x115   :  { %469 = shalt.err (!%p466_p8)
}
 0x116   :  { %s470_s14 = scalar_lea.hbm %s621_s4, 128 }
 0x117   :  { %p471_p9 = scmp.ne.s32.totalorder %s621_s4, %s470_s14  ;;  %p474_p10 = scmp.lt.u32.totalorder %s470_s14, %s621_s4 }
 0x119   :  { %p476_p11 = pnand %p474_p10, %p471_p9 }
 0x11b   :  { %479 = shalt.err (!%p476_p11)
}
 0x11c   :  { %349 = dma.vmem_to_hbm [thread:$0]  %s347_s27, 128, %s621_s4, [#allocation10]  }
 0x11d   :  { %484 = dma.done.wait [#allocation4], 128  }
 0x11e   :  { %485 = vsyncadd [#allocation4], 4294967168 }
 0x11f   :  { %486 = dma.done.wait [#allocation10], 128  }
 0x120   :  { %487 = vsyncadd [#allocation10], 4294967168 }
 0x121   :  { %356 = vsyncpa [#allocation3], 1 }
 0x122   :  { %357 = vsyncpa [#allocation6], 1 }
 0x123   :  { %358 = vsyncpa [#allocation4], 1 }
 0x124   :  { %359 = vsyncpa [#allocation10], 1 }

</bundles_post_ra>
